<compile_context>
chip_gen: v7x
topology: tpu7x:2x2x1
jax: 0.10.0
libtpu: 0.0.40
codegen_flags: <defaults>
</compile_context>

<pallas_src>
import jax
import jax.numpy as jnp
from jax import lax
from jax.experimental import pallas as pl
from jax.experimental.pallas import tpu as pltpu

LANES = 128


def _chip_row_tile_limit():
    """(max_row_tile, vmem_limit_bytes) tuned per TPU generation."""
    kind = ""
    try:
        kind = jax.devices()[0].device_kind.lower()
    except Exception:
        pass
    if ("v6" in kind) or ("v7" in kind) or ("tpu7" in kind):
        # 8192x128 f32 = 4 MiB/input block; 3 inputs x 2 bufs = 24 MiB
        # (+ 4 KiB accumulator). Under 64 MiB physical VMEM per v7x TC.
        return 8192, 48 * 1024 * 1024
    # v5e (16 MiB scoped default) and unknown chips: stay conservative.
    return 2048, None


def _num_tensorcores():
    """Best-effort TensorCores-per-chip (2 on multi-TC chips, else 1)."""
    try:
        info = pltpu.get_tpu_info()
        for attr in ("num_cores", "cores_per_chip", "num_tensorcores"):
            val = getattr(info, attr, None)
            if val:
                return max(1, min(2, int(val)))
    except Exception:
        pass
    try:
        return max(1, min(2, int(getattr(jax.devices()[0], "num_cores", 1))))
    except Exception:
        return 1


def _sublane_multiple(dtype):
    # Minimum sublane tiling multiple per dtype: f32 -> 8, bf16 -> 16, i8 -> 32.
    return max(8, 32 // max(1, jnp.dtype(dtype).itemsize))


def _make_kernel(row_tile, blocks_per_core, n_rows):
    """Build the kernel closure over static tiling parameters."""
    groups = row_tile // 8

    def kernel(pred_ref, targ_ref, mask_ref, out_ref, acc_ref):
        c = pl.program_id(0)   # core-parallel axis
        i = pl.program_id(1)   # sequential reduction axis

        @pl.when(i == 0)
        def _():
            acc_ref[...] = jnp.zeros_like(acc_ref)

        def block_contrib():
            p = pred_ref[...].astype(jnp.float32)
            t = targ_ref[...].astype(jnp.float32)
            m = mask_ref[...].astype(jnp.float32)
            # x10 and /N are folded into the wrapper epilogue.
            return jnp.abs(p - t) * (1.0 - m)

        def fold(x):
            # (row_tile, 128) -> (8, 128) using pure VPU adds (no XLU, no
            # tile-boundary-crossing reshape).
            return jnp.sum(x.reshape(groups, 8, LANES), axis=0)

        # Unclamped logical row offset of this block.
        row_base = (c * blocks_per_core + i) * row_tile

        # Fast path: every row of the block is in range -> no mask machinery.
        @pl.when(row_base + row_tile <= n_rows)
        def _():
            acc_ref[...] += fold(block_contrib())

        # Slow path: ragged final block, or the clamped duplicate block when
        # the 2-core split over-covers. Select (not multiply) so garbage in
        # out-of-range rows can never propagate NaN/Inf into the sum.
        @pl.when(row_base + row_tile > n_rows)
        def _():
            row_ids = row_base + lax.broadcasted_iota(
                jnp.int32, (row_tile, LANES), 0)
            contrib = jnp.where(row_ids < n_rows, block_contrib(),
                                jnp.float32(0.0))
            acc_ref[...] += fold(contrib)

        # Last reduction step for this core: publish the (8,128) partial
        # (lane-dense, unmasked store).
        @pl.when(i == pl.num_programs(1) - 1)
        def _():
            out_ref[...] = acc_ref[...].reshape(1, 8, LANES)

    return kernel


def l1_loss(pred, target, mask):
    """Masked weighted L1 loss: mean(|pred - target| * (1 - mask) * 10)."""
    assert pred.shape == target.shape == mask.shape
    n = pred.size
    pf, tf, mf = jnp.ravel(pred), jnp.ravel(target), jnp.ravel(mask)

    n128 = (n // LANES) * LANES          # lane-aligned prefix handled by kernel
    total = jnp.float32(0.0)

    if n128 > 0:
        rows = n128 // LANES
        p2 = pf[:n128].reshape(rows, LANES)
        t2 = tf[:n128].reshape(rows, LANES)
        m2 = mf[:n128].reshape(rows, LANES)

        max_row_tile, vmem_limit = _chip_row_tile_limit()
        align = max(_sublane_multiple(a.dtype) for a in (p2, t2, m2))
        if rows <= max_row_tile:
            row_tile = ((rows + align - 1) // align) * align
        else:
            row_tile = max_row_tile      # 2048 / 8192: multiples of 32

        n_blocks = pl.cdiv(rows, row_tile)
        ncores = min(_num_tensorcores(), n_blocks)
        blocks_per_core = pl.cdiv(n_blocks, ncores)

        if ncores == 1:
            def in_map(c, i):            # no clamp needed on a single core
                return (i, 0)
        else:
            def in_map(c, i):
                # Clamp keeps the DMA window in range; the duplicate block a
                # clamped index re-reads is zeroed by the in-kernel row mask.
                return (jnp.minimum(c * blocks_per_core + i, n_blocks - 1), 0)

        tile_spec = pl.BlockSpec((row_tile, LANES), in_map)
        kernel = _make_kernel(row_tile, blocks_per_core, rows)

        in_bytes = n128 * (p2.dtype.itemsize + t2.dtype.itemsize
                           + m2.dtype.itemsize)
        cost = pl.CostEstimate(flops=5 * n128, transcendentals=0,
                               bytes_accessed=in_bytes + ncores * 8 * LANES * 4)

        partials = pl.pallas_call(
            kernel,
            out_shape=jax.ShapeDtypeStruct((ncores, 8, LANES), jnp.float32),
            grid_spec=pltpu.PrefetchScalarGridSpec(
                num_scalar_prefetch=0,
                grid=(ncores, blocks_per_core),
                in_specs=[tile_spec, tile_spec, tile_spec],
                out_specs=pl.BlockSpec((1, 8, LANES), lambda c, i: (c, 0, 0)),
                scratch_shapes=[pltpu.VMEM((8, LANES), jnp.float32)],
            ),
            compiler_params=pltpu.CompilerParams(
                dimension_semantics=("parallel", "arbitrary"),
                vmem_limit_bytes=vmem_limit,
            ),
            cost_estimate=cost,
        )(p2, t2, m2)

        total = total + jnp.sum(partials)

    if n128 < n:
        # <128-element ragged tail: tiny plain-JAX add (replaces the old
        # full-array jnp.pad copy of all three inputs).
        pt = pf[n128:].astype(jnp.float32)
        tt = tf[n128:].astype(jnp.float32)
        mt = mf[n128:].astype(jnp.float32)
        total = total + jnp.sum(jnp.abs(pt - tt) * (1.0 - mt))

    # Fold the x10 weight and the mean divisor into one scalar multiply.
    return total * jnp.float32(10.0 / n)


if __name__ == "__main__":
    key = jax.random.PRNGKey(0)
    k1, k2, k3 = jax.random.split(key, 3)

    # NCHW shapes, small: batch=2, channels=4, spatial=16x16
    shape = (2, 4, 16, 16)
    pred = jax.random.normal(k1, shape, dtype=jnp.float32)
    target = jax.random.normal(k2, shape, dtype=jnp.float32)
    mask = (jax.random.uniform(k3, shape) > 0.5).astype(jnp.float32)

    out = jax.block_until_ready(l1_loss(pred, target, mask))

    # Reference check (plain JAX)
    ref = jnp.mean(jnp.abs(pred - target) * (1.0 - mask) * 10.0)
    assert jnp.allclose(out, ref, rtol=1e-5, atol=1e-5), (out, ref)

    print("KERNEL_OK")
</pallas_src>

<mosaic_0001>
module attributes {stable_mosaic.version = 11 : i64} {
  func.func @kernel(%arg0: i32, %arg1: i32, %arg2: memref<16x128xf32, #tpu.memory_space<vmem>>, %arg3: memref<16x128xf32, #tpu.memory_space<vmem>>, %arg4: memref<16x128xf32, #tpu.memory_space<vmem>>, %arg5: memref<1x8x128xf32, #tpu.memory_space<vmem>>, %arg6: memref<8x128xf32, #tpu.memory_space<vmem>>) attributes {dimension_semantics = [#tpu.dimension_semantics<parallel>, #tpu.dimension_semantics<arbitrary>], iteration_bounds = array<i64: 1, 1>, scalar_prefetch = 0 : i64, scratch_operands = 1 : i64, tpu.core_type = #tpu.core_type<tc>, window_params = [{transform_indices = @transform_0, window_bounds = array<i64: 16, 128>}, {transform_indices = @transform_1, window_bounds = array<i64: 16, 128>}, {transform_indices = @transform_2, window_bounds = array<i64: 16, 128>}, {transform_indices = @transform_3, window_bounds = array<i64: 1, 8, 128>}]} {
    %c0_i32 = arith.constant 0 : i32
    %0 = arith.cmpi eq, %arg1, %c0_i32 : i32
    %1 = arith.extui %0 : i1 to i32
    %c0_i32_0 = arith.constant 0 : i32
    %2 = arith.cmpi ne, %1, %c0_i32_0 : i32
    scf.if %2 {
      %cst = arith.constant 0.000000e+00 : f32
      %17 = vector.broadcast %cst : f32 to vector<8x128xf32>
      %c0 = arith.constant 0 : index
      %c0_9 = arith.constant 0 : index
      %18 = vector.load %arg6[%c0, %c0_9] : memref<8x128xf32, #tpu.memory_space<vmem>>, vector<8x128xf32>
      tpu.vector_store %arg6[%c0, %c0_9], %17 {strides = array<i32>} : memref<8x128xf32, #tpu.memory_space<vmem>>, vector<8x128xf32>,
    } else {
    }
    %c1_i32 = arith.constant 1 : i32
    %3 = arith.muli %arg0, %c1_i32 : i32
    %4 = arith.addi %3, %arg1 : i32
    %c16_i32 = arith.constant 16 : i32
    %5 = arith.muli %4, %c16_i32 : i32
    %c16_i32_1 = arith.constant 16 : i32
    %6 = arith.addi %5, %c16_i32_1 : i32
    %c16_i32_2 = arith.constant 16 : i32
    %7 = arith.cmpi sle, %6, %c16_i32_2 : i32
    %8 = arith.extui %7 : i1 to i32
    %c0_i32_3 = arith.constant 0 : i32
    %9 = arith.cmpi ne, %8, %c0_i32_3 : i32
    scf.if %9 {
      %c0 = arith.constant 0 : index
      %c0_9 = arith.constant 0 : index
      %17 = vector.load %arg6[%c0, %c0_9] : memref<8x128xf32, #tpu.memory_space<vmem>>, vector<8x128xf32>
      %c0_10 = arith.constant 0 : index
      %c0_11 = arith.constant 0 : index
      %18 = vector.load %arg2[%c0_10, %c0_11] : memref<16x128xf32, #tpu.memory_space<vmem>>, vector<16x128xf32>
      %c0_12 = arith.constant 0 : index
      %c0_13 = arith.constant 0 : index
      %19 = vector.load %arg3[%c0_12, %c0_13] : memref<16x128xf32, #tpu.memory_space<vmem>>, vector<16x128xf32>
      %c0_14 = arith.constant 0 : index
      %c0_15 = arith.constant 0 : index
      %20 = vector.load %arg4[%c0_14, %c0_15] : memref<16x128xf32, #tpu.memory_space<vmem>>, vector<16x128xf32>
      %21 = arith.subf %18, %19 : vector<16x128xf32>
      %22 = math.absf %21 : vector<16x128xf32>
      %cst = arith.constant 1.000000e+00 : f32
      %23 = vector.broadcast %cst : f32 to vector<16x128xf32>
      %24 = arith.subf %23, %20 : vector<16x128xf32>
      %25 = arith.mulf %22, %24 : vector<16x128xf32>
      %26 = vector.shape_cast %25 : vector<16x128xf32> to vector<2x8x128xf32>
      %cst_16 = arith.constant dense<0.000000e+00> : vector<8x128xf32>
      %27 = vector.multi_reduction <add>, %26, %cst_16 [0] : vector<2x8x128xf32> to vector<8x128xf32>
      %28 = arith.addf %17, %27 : vector<8x128xf32>
      %c0_17 = arith.constant 0 : index
      %c0_18 = arith.constant 0 : index
      %29 = vector.load %arg6[%c0_17, %c0_18] : memref<8x128xf32, #tpu.memory_space<vmem>>, vector<8x128xf32>
      tpu.vector_store %arg6[%c0_17, %c0_18], %28 {strides = array<i32>} : memref<8x128xf32, #tpu.memory_space<vmem>>, vector<8x128xf32>,
    } else {
    }
    %c16_i32_4 = arith.constant 16 : i32
    %10 = arith.addi %5, %c16_i32_4 : i32
    %c16_i32_5 = arith.constant 16 : i32
    %11 = arith.cmpi sgt, %10, %c16_i32_5 : i32
    %12 = arith.extui %11 : i1 to i32
    %c0_i32_6 = arith.constant 0 : i32
    %13 = arith.cmpi ne, %12, %c0_i32_6 : i32
    scf.if %13 {
      %17 = tpu.iota {dimensions = array<i32: 0>} : vector<16x128xi32>
      %18 = vector.broadcast %5 : i32 to vector<16x128xi32>
      %19 = arith.addi %18, %17 : vector<16x128xi32>
      %c16_i32_9 = arith.constant 16 : i32
      %20 = vector.broadcast %c16_i32_9 : i32 to vector<16x128xi32>
      %21 = arith.cmpi slt, %19, %20 : vector<16x128xi32>
      %c0 = arith.constant 0 : index
      %c0_10 = arith.constant 0 : index
      %22 = vector.load %arg2[%c0, %c0_10] : memref<16x128xf32, #tpu.memory_space<vmem>>, vector<16x128xf32>
      %c0_11 = arith.constant 0 : index
      %c0_12 = arith.constant 0 : index
      %23 = vector.load %arg3[%c0_11, %c0_12] : memref<16x128xf32, #tpu.memory_space<vmem>>, vector<16x128xf32>
      %c0_13 = arith.constant 0 : index
      %c0_14 = arith.constant 0 : index
      %24 = vector.load %arg4[%c0_13, %c0_14] : memref<16x128xf32, #tpu.memory_space<vmem>>, vector<16x128xf32>
      %25 = arith.subf %22, %23 : vector<16x128xf32>
      %26 = math.absf %25 : vector<16x128xf32>
      %cst = arith.constant 1.000000e+00 : f32
      %27 = vector.broadcast %cst : f32 to vector<16x128xf32>
      %28 = arith.subf %27, %24 : vector<16x128xf32>
      %29 = arith.mulf %26, %28 : vector<16x128xf32>
      %cst_15 = arith.constant 0.000000e+00 : f32
      %30 = vector.broadcast %cst_15 : f32 to vector<16x128xf32>
      %31 = arith.select %21, %29, %30 : vector<16x128xi1>, vector<16x128xf32>
      %c0_16 = arith.constant 0 : index
      %c0_17 = arith.constant 0 : index
      %32 = vector.load %arg6[%c0_16, %c0_17] : memref<8x128xf32, #tpu.memory_space<vmem>>, vector<8x128xf32>
      %33 = vector.shape_cast %31 : vector<16x128xf32> to vector<2x8x128xf32>
      %cst_18 = arith.constant dense<0.000000e+00> : vector<8x128xf32>
      %34 = vector.multi_reduction <add>, %33, %cst_18 [0] : vector<2x8x128xf32> to vector<8x128xf32>
      %35 = arith.addf %32, %34 : vector<8x128xf32>
      %c0_19 = arith.constant 0 : index
      %c0_20 = arith.constant 0 : index
      %36 = vector.load %arg6[%c0_19, %c0_20] : memref<8x128xf32, #tpu.memory_space<vmem>>, vector<8x128xf32>
      tpu.vector_store %arg6[%c0_19, %c0_20], %35 {strides = array<i32>} : memref<8x128xf32, #tpu.memory_space<vmem>>, vector<8x128xf32>,
    } else {
    }
    %c0_i32_7 = arith.constant 0 : i32
    %14 = arith.cmpi eq, %arg1, %c0_i32_7 : i32
    %15 = arith.extui %14 : i1 to i32
    %c0_i32_8 = arith.constant 0 : i32
    %16 = arith.cmpi ne, %15, %c0_i32_8 : i32
    scf.if %16 {
      %c0 = arith.constant 0 : index
      %c0_9 = arith.constant 0 : index
      %17 = vector.load %arg6[%c0, %c0_9] : memref<8x128xf32, #tpu.memory_space<vmem>>, vector<8x128xf32>
      %18 = vector.shape_cast %17 : vector<8x128xf32> to vector<1x8x128xf32>
      %c0_10 = arith.constant 0 : index
      %c0_11 = arith.constant 0 : index
      %c0_12 = arith.constant 0 : index
      %19 = vector.load %arg5[%c0_10, %c0_11, %c0_12] : memref<1x8x128xf32, #tpu.memory_space<vmem>>, vector<1x8x128xf32>
      tpu.vector_store %arg5[%c0_10, %c0_11, %c0_12], %18 {strides = array<i32>} : memref<1x8x128xf32, #tpu.memory_space<vmem>>, vector<1x8x128xf32>,
    } else {
    }
    return
  }
  func.func @transform_0(%arg0: i32, %arg1: i32) -> (i32, i32) {
    %c0_i32 = arith.constant 0 : i32
    %c0_i32_0 = arith.constant 0 : i32
    return %arg1, %c0_i32 : i32, i32
  }
  func.func @transform_1(%arg0: i32, %arg1: i32) -> (i32, i32) {
    %c0_i32 = arith.constant 0 : i32
    %c0_i32_0 = arith.constant 0 : i32
    return %arg1, %c0_i32 : i32, i32
  }
  func.func @transform_2(%arg0: i32, %arg1: i32) -> (i32, i32) {
    %c0_i32 = arith.constant 0 : i32
    %c0_i32_0 = arith.constant 0 : i32
    return %arg1, %c0_i32 : i32, i32
  }
  func.func @transform_3(%arg0: i32, %arg1: i32) -> (i32, i32, i32) {
    %c0_i32 = arith.constant 0 : i32
    %c0_i32_0 = arith.constant 0 : i32
    %c0_i32_1 = arith.constant 0 : i32
    return %arg0, %c0_i32, %c0_i32_0 : i32, i32, i32
  }
}

</mosaic_0001>

<bundles_post_ra>
// kernel: tpu_custom_call.1
= control target key start
LH: loop header
LB: loop body
LE: loop exit
PB: predicated region body
PF: predicated region fallthrough
CT: control target
= control target key end

     0   :  { %8 = vsyncpa [#allocation4], 0  ;;  %s329_s0 = inlined_call_operand.hbm [shape: f32[16,128], index: 0, kind: input, shape index: {}]   ;;  %s330_s1 = inlined_call_operand.hbm [shape: f32[16,128], index: 1, kind: input, shape index: {}]   ;;  %s331_s2 = inlined_call_operand.hbm [shape: f32[16,128], index: 2, kind: input, shape index: {}]   ;;  %s332_s3 = inlined_call_operand.hbm [shape: f32[1,8,128], index: 3, kind: output, shape index: {}]  }
   0x1   :  { %9 = vsyncpa [#allocation7], 0 }
   0x2   :  { %10 = vsyncpa [#allocation5], 0  ;;  %s239_s12 = smov [#allocation6]   ;;  %s240_s14 = smov [#allocation3]  }
   0x3   :  { %s28_s13 = sshll.u32 %s239_s12, 4  ;;  %s16_s15 = sshll.u32 %s240_s14, 4  ;;  %s29_s13 = int_to_ptr.vmem [resolvable:$true] %s28_s13  ;;  %s265_s15 = int_to_ptr.vmem [resolvable:$true] %s16_s15 }
   0x4   :  { %s145_s18 = scalar_lea.hbm %s330_s1, 256 }
   0x5   :  { %p146_p0 = scmp.ne.s32.totalorder %s330_s1, %s145_s18  ;;  %p149_p1 = scmp.lt.u32.totalorder %s145_s18, %s330_s1 }
   0x7   :  { %p151_p2 = pnand %p149_p1, %p146_p0 }
   0x9   :  { %154 = shalt.err (!%p151_p2)
}
   0xa   :  { %s155_s23 = scalar_lea.vmem %s29_s13, 256  ;;  %p160_p4 = scmp.lt.s32.totalorder %s29_s13, %s29_s13 }
   0xb   :  { %p156_p3 = scmp.ne.s32.totalorder %s29_s13, %s155_s23  ;;  %p161_p5 = scmp.lt.s32.totalorder %s155_s23, %s155_s23 }
   0xd   :  { %p162_p6 = por %p161_p5, %p160_p4 }
   0xf   :  { %p163_p7 = pnand %p162_p6, %p156_p3 }
  0x11   :  { %166 = shalt.err (!%p163_p7)
}
  0x12   :  { %s241_s24 = smov 128   ;;  %s242_s25 = smov 8  }
  0x13   :  { %34 = dma.hbm_to_vmem [thread:$0]  %s330_s1, 256, %s29_s13, [#allocation7], %s241_s24, %s241_s24, %s242_s25  }
  0x14   :  { %s167_s30 = scalar_lea.hbm %s329_s0, 256 }
  0x15   :  { %p168_p8 = scmp.ne.s32.totalorder %s329_s0, %s167_s30  ;;  %p171_p9 = scmp.lt.u32.totalorder %s167_s30, %s329_s0 }
  0x17   :  { %p173_p10 = pnand %p171_p9, %p168_p8 }
  0x19   :  { %176 = shalt.err (!%p173_p10)
}
  0x1a   :  { %s177_s8 = scalar_lea.vmem %s265_s15, 256  ;;  %p182_p12 = scmp.lt.s32.totalorder %s265_s15, %s265_s15 }
  0x1b   :  { %p178_p11 = scmp.ne.s32.totalorder %s265_s15, %s177_s8  ;;  %p183_p13 = scmp.lt.s32.totalorder %s177_s8, %s177_s8 }
  0x1d   :  { %p184_p0 = por %p183_p13, %p182_p12 }
  0x1f   :  { %p185_p1 = pnand %p184_p0, %p178_p11 }
  0x21   :  { %188 = shalt.err (!%p185_p1)
}
  0x22   :  { %22 = dma.hbm_to_vmem [thread:$0]  %s329_s0, 256, %s265_s15, [#allocation4], %s241_s24, %s241_s24, %s242_s25  }
  0x23   :  { %s243_s10 = smov [#allocation8]   ;;  %s189_s14 = scalar_lea.hbm %s331_s2, 256 }
  0x24   :  { %s40_s11 = sshll.u32 %s243_s10, 4  ;;  %p190_p2 = scmp.ne.s32.totalorder %s331_s2, %s189_s14  ;;  %s41_s11 = int_to_ptr.vmem [resolvable:$true] %s40_s11 }
  0x25   :  { %p193_p3 = scmp.lt.u32.totalorder %s189_s14, %s331_s2 }
  0x27   :  { %p195_p4 = pnand %p193_p3, %p190_p2 }
  0x29   :  { %198 = shalt.err (!%p195_p4)
}
  0x2a   :  { %s199_s20 = scalar_lea.vmem %s41_s11, 256  ;;  %p204_p6 = scmp.lt.s32.totalorder %s41_s11, %s41_s11 }
  0x2b   :  { %p200_p5 = scmp.ne.s32.totalorder %s41_s11, %s199_s20  ;;  %p205_p7 = scmp.lt.s32.totalorder %s199_s20, %s199_s20 }
  0x2d   :  { %p206_p8 = por %p205_p7, %p204_p6 }
  0x2f   :  { %p207_p9 = pnand %p206_p8, %p200_p5 }
  0x31   :  { %210 = shalt.err (!%p207_p9)
}
  0x32   :  { %46 = dma.hbm_to_vmem [thread:$0]  %s331_s2, 256, %s41_s11, [#allocation7], %s241_s24, %s241_s24, %s242_s25  }
  0x33   :  { %233 = dma.done.wait [#allocation4], 256  }
  0x34   :  { %234 = vsyncadd [#allocation4], 4294967040 }
  0x35   :  { %235 = dma.done.wait [#allocation7], 512  }
  0x36   :  { %236 = vsyncadd [#allocation7], 4294966784  ;;  %v69_v0 = vld [vmem:[#allocation3] sm:$0xff]  ;;  %v70_v1 = vld [vmem:[#allocation3 + $0x8] sm:$0xff]  ;;  %s244_s21 = smov [#allocation9]  }
  0x37   :  { %v71_v2 = vld [vmem:[#allocation6] sm:$0xff]  ;;  %v72_v3 = vld [vmem:[#allocation6 + $0x8] sm:$0xff]  ;;  %v73_v4 = vld [vmem:[#allocation8] sm:$0xff]  ;;  %s129_s22 = sshll.u32 %s244_s21, 4  ;;  %s130_s22 = int_to_ptr.vmem [resolvable:$true] %s129_s22 }
  0x38   :  { %v74_v5 = vld [vmem:[#allocation8 + $0x8] sm:$0xff]  ;;  %v75_v6 = vsub.f32 %v69_v0, %v71_v2  ;;  %v76_v7 = vsub.f32 %v70_v1, %v72_v3  ;;  %v79_v8 = vsub.f32 1.0, %v73_v4  ;;  %s211_s2 = scalar_lea.vmem %s130_s22, 128  ;;  %p216_p11 = scmp.lt.s32.totalorder %s130_s22, %s130_s22 }
  0x39   :  { %v80_v9 = vsub.f32 1.0, %v74_v5  ;;  %p212_p10 = scmp.ne.s32.totalorder %s130_s22, %s211_s2  ;;  %p217_p12 = scmp.lt.s32.totalorder %s211_s2, %s211_s2 }
  0x3a   :  { %v77_v10 = vand.u32 2147483647, %v75_v6  ;;  %v78_v11 = vand.u32 2147483647, %v76_v7 }
  0x3b   :  { %p218_p13 = por %p217_p12, %p216_p11 }
  0x3c   :  { %v81_v12 = vmul.f32 %v79_v8, %v77_v10  ;;  %v82_v13 = vmul.f32 %v80_v9, %v78_v11 }
  0x3d   :  { %p219_p0 = pnand %p218_p13, %p212_p10 }
  0x3e   :  { %v83_v14 = vadd.f32 %v82_v13, %v81_v12 }
  0x40   :  { %122 = vst [vmem:[#allocation9] sm:$0xff] %v83_v14 }
  0x41   :  { %222 = shalt.err (!%p219_p0)
}
  0x42   :  { %s223_s25 = scalar_lea.hbm %s332_s3, 128 }
  0x43   :  { %p224_p1 = scmp.ne.s32.totalorder %s332_s3, %s223_s25  ;;  %p227_p2 = scmp.lt.u32.totalorder %s223_s25, %s332_s3 }
  0x45   :  { %p229_p3 = pnand %p227_p2, %p224_p1 }
  0x47   :  { %232 = shalt.err (!%p229_p3)
}
  0x48   :  { %132 = dma.vmem_to_hbm [thread:$0]  %s130_s22, 128, %s332_s3, [#allocation5]  }
  0x49   :  { %237 = dma.done.wait [#allocation5], 128  }
  0x4a   :  { %238 = vsyncadd [#allocation5], 4294967168 }
  0x4b   :  { %136 = vsyncpa [#allocation4], 1 }
  0x4c   :  { %137 = vsyncpa [#allocation7], 1 }
  0x4d   :  { %138 = vsyncpa [#allocation5], 1 }

</bundles_post_ra>
